<compile_context>
chip_gen: v5e
topology: v5e:2x2
jax: 0.10.0
libtpu: 0.0.40
codegen_flags: <defaults>
</compile_context>

<pallas_src>
import functools

import jax
import jax.numpy as jnp
from jax.experimental import pallas as pl
from jax.experimental.pallas import tpu as pltpu


# ----------------------------- Pallas kernel ----------------------------- #

def fc_kernel(x_ref, w1_ref, b1_ref, w2_ref, b2_ref, w3_ref, b3_ref,
              out_ref, *, text):
    # fc1 + ReLU   (bf16 MXU inputs, f32 accumulation)
    h1 = jnp.dot(x_ref[...], w1_ref[...],
                 preferred_element_type=jnp.float32) + b1_ref[...]
    h1 = jnp.maximum(h1, 0.0)
    # TODO(synk): nn.Dropout is identity here (eval mode); PyTorch RNG masking not reproduced.

    # fc2 + ReLU
    h2 = jnp.dot(h1.astype(jnp.bfloat16), w2_ref[...],
                 preferred_element_type=jnp.float32) + b2_ref[...]
    h2 = jnp.maximum(h2, 0.0)

    # fc3: out_features == 1  ->  VPU multiply + XLU lane reduce instead of an
    # MXU matmul with a single output column.
    w3_row = w3_ref[...].astype(jnp.float32)              # (1, H2)
    h3 = jnp.sum(h2 * w3_row, axis=-1, keepdims=True) + b3_ref[...]
    if not text:
        h3 = jnp.maximum(h3, 0.0)
    out_ref[...] = h3


def fc_pallas(x, params, *, text=True, block_b=256):
    """params: w1 (F,H1), b1 (1,H1), w2 (H1,H2), b2 (1,H2), w3 (H2,1), b3 (1,1).

    Weights are the PyTorch Linear weights pre-transposed to (in_dim, out_dim).
    """
    B, F = x.shape
    H1 = params["w1"].shape[1]
    H2 = params["w2"].shape[1]
    C = params["w3"].shape[1]
    assert C == 1, "Fc.fc3 always has out_features == 1"
    block_b = min(block_b, B)

    # Cast MXU operands to bf16 once in the wrapper (halves x's DMA bytes and
    # removes per-tile casts in the kernel); biases stay f32.
    x_bf16 = x.astype(jnp.bfloat16)
    w1 = params["w1"].astype(jnp.bfloat16)
    w2 = params["w2"].astype(jnp.bfloat16)
    w3 = params["w3"].reshape(1, H2 * C).astype(jnp.bfloat16)   # (1, H2) row
    b1, b2, b3 = params["b1"], params["b2"], params["b3"]

    def const_spec(shape):
        # Constant block index -> fetched into VMEM once, reused every tile.
        return pl.BlockSpec(shape, lambda i: (0, 0))

    return pl.pallas_call(
        functools.partial(fc_kernel, text=text),
        out_shape=jax.ShapeDtypeStruct((B, C), jnp.float32),
        grid=(pl.cdiv(B, block_b),),
        in_specs=[
            pl.BlockSpec((block_b, F), lambda i: (i, 0)),   # x batch tile
            const_spec((F, H1)), const_spec((1, H1)),
            const_spec((H1, H2)), const_spec((1, H2)),
            const_spec((1, H2)), const_spec((1, C)),
        ],
        out_specs=pl.BlockSpec((block_b, C), lambda i: (i, 0)),
        compiler_params=pltpu.CompilerParams(
            dimension_semantics=("parallel",)),
    )(x_bf16, w1, b1, w2, b2, w3, b3)


# --------------------------- pure-jnp references -------------------------- #

def fc_reference_bf16(x, params, *, text=True):
    """Mirrors the kernel math exactly (bf16 MXU inputs, f32 accumulate)."""
    xb = x.astype(jnp.bfloat16)
    w1 = params["w1"].astype(jnp.bfloat16)
    w2 = params["w2"].astype(jnp.bfloat16)
    w3 = params["w3"].astype(jnp.bfloat16)
    h1 = jnp.maximum(jnp.dot(xb, w1, preferred_element_type=jnp.float32)
                     + params["b1"], 0.0)
    h2 = jnp.maximum(jnp.dot(h1.astype(jnp.bfloat16), w2,
                             preferred_element_type=jnp.float32)
                     + params["b2"], 0.0)
    h3 = jnp.sum(h2 * w3.reshape(1, -1).astype(jnp.float32),
                 axis=-1, keepdims=True) + params["b3"]
    return h3 if text else jnp.maximum(h3, 0.0)


def fc_reference_f32(x, params, *, text=True):
    """Full-precision reference of the PyTorch forward (eval-mode dropout)."""
    h1 = jnp.maximum(x @ params["w1"] + params["b1"], 0.0)
    h2 = jnp.maximum(h1 @ params["w2"] + params["b2"], 0.0)
    h3 = h2 @ params["w3"] + params["b3"]
    return h3 if text else jnp.maximum(h3, 0.0)


# ------------------------------- main ------------------------------------ #

if __name__ == "__main__":
    key = jax.random.PRNGKey(0)
    keys = jax.random.split(key, 8)

    # Small, forward-consistent sizes (lane-dense hidden widths).
    B = 8          # batch
    FEAT = 256     # `feature` (fc1 input dim)
    H1 = 128       # opt.hidden1
    H2 = 128       # opt.hidden2
    C = 1          # fc3 output
    TEXT = True    # opt.text -> no ReLU after fc3

    scale = 0.1
    params = {
        # Pre-transposed (in_dim, out_dim) weights; biases as (1, out_dim).
        "w1": scale * jax.random.normal(keys[0], (FEAT, H1), jnp.float32),
        "b1": scale * jax.random.normal(keys[1], (1, H1), jnp.float32),
        "w2": scale * jax.random.normal(keys[2], (H1, H2), jnp.float32),
        "b2": scale * jax.random.normal(keys[3], (1, H2), jnp.float32),
        "w3": scale * jax.random.normal(keys[4], (H2, C), jnp.float32),
        "b3": scale * jax.random.normal(keys[5], (1, C), jnp.float32),
    }
    x = jax.random.normal(keys[6], (B, FEAT), jnp.float32)

    out = fc_pallas(x, params, text=TEXT)
    out = jax.block_until_ready(out)
    assert out.shape == (B, C)

    # Exact-math check (same bf16 matmul path) ...
    ref_bf16 = fc_reference_bf16(x, params, text=TEXT)
    assert jnp.allclose(out, ref_bf16, atol=1e-4, rtol=1e-4), (out, ref_bf16)
    # ... and sanity check against the full-f32 PyTorch-equivalent forward.
    ref_f32 = fc_reference_f32(x, params, text=TEXT)
    assert jnp.allclose(out, ref_f32, atol=1e-1, rtol=1e-1), (out, ref_f32)

    print("KERNEL_OK")
</pallas_src>

<mosaic_0001>
module attributes {stable_mosaic.version = 11 : i64} {
  func.func @fc_kernel(%arg0: i32, %arg1: memref<8x256xbf16, #tpu.memory_space<vmem>>, %arg2: memref<256x128xbf16, #tpu.memory_space<vmem>>, %arg3: memref<1x128xf32, #tpu.memory_space<vmem>>, %arg4: memref<128x128xbf16, #tpu.memory_space<vmem>>, %arg5: memref<1x128xf32, #tpu.memory_space<vmem>>, %arg6: memref<1x128xbf16, #tpu.memory_space<vmem>>, %arg7: memref<1x1xf32, #tpu.memory_space<vmem>>, %arg8: memref<8x1xf32, #tpu.memory_space<vmem>>) attributes {dimension_semantics = [#tpu.dimension_semantics<parallel>], iteration_bounds = array<i64: 1>, scalar_prefetch = 0 : i64, scratch_operands = 0 : i64, tpu.core_type = #tpu.core_type<tc>, window_params = [{transform_indices = @transform_0, window_bounds = array<i64: 8, 256>}, {pipeline_mode = #tpu.pipeline_mode<synchronous>, transform_indices = @transform_1, window_bounds = array<i64: 256, 128>}, {pipeline_mode = #tpu.pipeline_mode<synchronous>, transform_indices = @transform_2, window_bounds = array<i64: 1, 128>}, {pipeline_mode = #tpu.pipeline_mode<synchronous>, transform_indices = @transform_3, window_bounds = array<i64: 128, 128>}, {pipeline_mode = #tpu.pipeline_mode<synchronous>, transform_indices = @transform_4, window_bounds = array<i64: 1, 128>}, {pipeline_mode = #tpu.pipeline_mode<synchronous>, transform_indices = @transform_5, window_bounds = array<i64: 1, 128>}, {pipeline_mode = #tpu.pipeline_mode<synchronous>, transform_indices = @transform_6, window_bounds = array<i64: 1, 1>}, {transform_indices = @transform_7, window_bounds = array<i64: 8, 1>}]} {
    %c0 = arith.constant 0 : index
    %c0_0 = arith.constant 0 : index
    %0 = vector.load %arg1[%c0, %c0_0] : memref<8x256xbf16, #tpu.memory_space<vmem>>, vector<8x256xbf16>
    %c0_1 = arith.constant 0 : index
    %c0_2 = arith.constant 0 : index
    %1 = vector.load %arg2[%c0_1, %c0_2] : memref<256x128xbf16, #tpu.memory_space<vmem>>, vector<256x128xbf16>
    %cst = arith.constant dense<0.000000e+00> : vector<8x128xf32>
    %2 = tpu.matmul %0, %1, %cst {dimension_numbers = #tpu.dot_dimension_numbers<[1], [0], [0], [1], [0, 0, 1, 1], [], []>} : vector<8x256xbf16>, vector<256x128xbf16>, vector<8x128xf32> -> vector<8x128xf32>
    %c0_3 = arith.constant 0 : index
    %c0_4 = arith.constant 0 : index
    %3 = vector.load %arg3[%c0_3, %c0_4] : memref<1x128xf32, #tpu.memory_space<vmem>>, vector<1x128xf32>
    %4 = vector.broadcast %3 : vector<1x128xf32> to vector<8x128xf32>
    %5 = arith.addf %2, %4 : vector<8x128xf32>
    %cst_5 = arith.constant 0.000000e+00 : f32
    %6 = vector.broadcast %cst_5 : f32 to vector<8x128xf32>
    %7 = arith.maximumf %5, %6 : vector<8x128xf32>
    %8 = arith.truncf %7 : vector<8x128xf32> to vector<8x128xbf16>
    %c0_6 = arith.constant 0 : index
    %c0_7 = arith.constant 0 : index
    %9 = vector.load %arg4[%c0_6, %c0_7] : memref<128x128xbf16, #tpu.memory_space<vmem>>, vector<128x128xbf16>
    %cst_8 = arith.constant dense<0.000000e+00> : vector<8x128xf32>
    %10 = tpu.matmul %8, %9, %cst_8 {dimension_numbers = #tpu.dot_dimension_numbers<[1], [0], [0], [1], [0, 0, 1, 1], [], []>} : vector<8x128xbf16>, vector<128x128xbf16>, vector<8x128xf32> -> vector<8x128xf32>
    %c0_9 = arith.constant 0 : index
    %c0_10 = arith.constant 0 : index
    %11 = vector.load %arg5[%c0_9, %c0_10] : memref<1x128xf32, #tpu.memory_space<vmem>>, vector<1x128xf32>
    %12 = vector.broadcast %11 : vector<1x128xf32> to vector<8x128xf32>
    %13 = arith.addf %10, %12 : vector<8x128xf32>
    %cst_11 = arith.constant 0.000000e+00 : f32
    %14 = vector.broadcast %cst_11 : f32 to vector<8x128xf32>
    %15 = arith.maximumf %13, %14 : vector<8x128xf32>
    %c0_12 = arith.constant 0 : index
    %c0_13 = arith.constant 0 : index
    %16 = vector.load %arg6[%c0_12, %c0_13] : memref<1x128xbf16, #tpu.memory_space<vmem>>, vector<1x128xbf16>
    %17 = arith.extf %16 : vector<1x128xbf16> to vector<1x128xf32>
    %18 = vector.broadcast %17 : vector<1x128xf32> to vector<8x128xf32>
    %19 = arith.mulf %15, %18 : vector<8x128xf32>
    %cst_14 = arith.constant dense<0.000000e+00> : vector<8xf32>
    %20 = vector.multi_reduction <add>, %19, %cst_14 [1] : vector<8x128xf32> to vector<8xf32>
    %21 = vector.shape_cast %20 : vector<8xf32> to vector<8x1xf32>
    %c0_15 = arith.constant 0 : index
    %c0_16 = arith.constant 0 : index
    %22 = vector.load %arg7[%c0_15, %c0_16] : memref<1x1xf32, #tpu.memory_space<vmem>>, vector<1x1xf32>
    %23 = vector.broadcast %22 : vector<1x1xf32> to vector<8x1xf32>
    %24 = arith.addf %21, %23 : vector<8x1xf32>
    %c0_17 = arith.constant 0 : index
    %c0_18 = arith.constant 0 : index
    %25 = vector.load %arg8[%c0_17, %c0_18] : memref<8x1xf32, #tpu.memory_space<vmem>>, vector<8x1xf32>
    tpu.vector_store %arg8[%c0_17, %c0_18], %24 {strides = array<i32>} : memref<8x1xf32, #tpu.memory_space<vmem>>, vector<8x1xf32>,
    return
  }
  func.func @transform_0(%arg0: i32) -> (i32, i32) {
    %c0_i32 = arith.constant 0 : i32
    %c0_i32_0 = arith.constant 0 : i32
    return %arg0, %c0_i32 : i32, i32
  }
  func.func @transform_1(%arg0: i32) -> (i32, i32) {
    %c0_i32 = arith.constant 0 : i32
    %c0_i32_0 = arith.constant 0 : i32
    %c0_i32_1 = arith.constant 0 : i32
    return %c0_i32, %c0_i32_0 : i32, i32
  }
  func.func @transform_2(%arg0: i32) -> (i32, i32) {
    %c0_i32 = arith.constant 0 : i32
    %c0_i32_0 = arith.constant 0 : i32
    %c0_i32_1 = arith.constant 0 : i32
    return %c0_i32, %c0_i32_0 : i32, i32
  }
  func.func @transform_3(%arg0: i32) -> (i32, i32) {
    %c0_i32 = arith.constant 0 : i32
    %c0_i32_0 = arith.constant 0 : i32
    %c0_i32_1 = arith.constant 0 : i32
    return %c0_i32, %c0_i32_0 : i32, i32
  }
  func.func @transform_4(%arg0: i32) -> (i32, i32) {
    %c0_i32 = arith.constant 0 : i32
    %c0_i32_0 = arith.constant 0 : i32
    %c0_i32_1 = arith.constant 0 : i32
    return %c0_i32, %c0_i32_0 : i32, i32
  }
  func.func @transform_5(%arg0: i32) -> (i32, i32) {
    %c0_i32 = arith.constant 0 : i32
    %c0_i32_0 = arith.constant 0 : i32
    %c0_i32_1 = arith.constant 0 : i32
    return %c0_i32, %c0_i32_0 : i32, i32
  }
  func.func @transform_6(%arg0: i32) -> (i32, i32) {
    %c0_i32 = arith.constant 0 : i32
    %c0_i32_0 = arith.constant 0 : i32
    %c0_i32_1 = arith.constant 0 : i32
    return %c0_i32, %c0_i32_0 : i32, i32
  }
  func.func @transform_7(%arg0: i32) -> (i32, i32) {
    %c0_i32 = arith.constant 0 : i32
    %c0_i32_0 = arith.constant 0 : i32
    return %arg0, %c0_i32 : i32, i32
  }
}

</mosaic_0001>

<bundles_post_ra>
// kernel: tpu_custom_call.1
= control target key start
LH: loop header
LB: loop body
LE: loop exit
PB: predicated region body
PF: predicated region fallthrough
CT: control target
= control target key end

     0   :  { %s615_s0 = inlined_call_operand.hbm [shape: bf16[8,256], index: 0, kind: input, shape index: {}]   ;;  %s616_s1 = inlined_call_operand.hbm [shape: bf16[256,128], index: 1, kind: input, shape index: {}]   ;;  %s617_s2 = inlined_call_operand.vmem [shape: f32[1,128], index: 2, kind: input, shape index: {}]   ;;  %s618_s3 = inlined_call_operand.hbm [shape: bf16[128,128], index: 3, kind: input, shape index: {}]   ;;  %s619_s4 = inlined_call_operand.vmem [shape: f32[1,128], index: 4, kind: input, shape index: {}]   ;;  %s620_s5 = inlined_call_operand.vmem [shape: bf16[1,128], index: 5, kind: input, shape index: {}]   ;;  %s621_s6 = inlined_call_operand.<no memory space> [shape: f32[1,1], index: 6, kind: input, shape index: {}]   ;;  %s622_s7 = inlined_call_operand.vmem [shape: f32[8,1], index: 7, kind: output, shape index: {}]  }
   0x1   :  { %v12_v0 = vstv %s621_s6 }
   0x2   :  { %13 = vst [vmem:[#allocation2] sm:$0x1] %v12_v0 }
   0x3   :  { %14 = vsyncpa [#allocation4], 0 }
   0x4   :  { %15 = vsyncpa [#allocation6], 0  ;;  %s31_s28 = sshll.u32 %s616_s1, 4  ;;  %s546_s29 = smov [#allocation5]   ;;  %s32_s28 = int_to_ptr.hbm [resolvable:$true] %s31_s28 }
   0x5   :  { %s33_s30 = sshll.u32 %s546_s29, 4  ;;  %s21_s10 = sshll.u32 %s615_s0, 4  ;;  %s34_s30 = int_to_ptr.vmem [resolvable:$true] %s33_s30  ;;  %s22_s10 = int_to_ptr.hbm [resolvable:$true] %s21_s10 }
   0x6   :  { %s547_s11 = smov 64   ;;  %s548_s12 = smov 4  }
   0x7   :  { %39 = dma.hbm_to_vmem [thread:$0]  %s32_s28, 2048, %s34_s30, [#allocation6], %s547_s11, %s547_s11, %s548_s12  }
   0x8   :  { %s549_s6 = smov [#allocation3]   ;;  %s46_s16 = sshll.u32 %s618_s3, 4  ;;  %s47_s16 = int_to_ptr.hbm [resolvable:$true] %s46_s16 }
   0x9   :  { %s23_s13 = sshll.u32 %s549_s6, 4  ;;  %s550_s1 = smov [#allocation7]   ;;  %s24_s13 = int_to_ptr.vmem [resolvable:$true] %s23_s13 }
   0xa   :  { %26 = dma.hbm_to_vmem [thread:$0]  %s22_s10, 128, %s24_s13, [#allocation4]  }
   0xb   :  { %s48_s17 = sshll.u32 %s550_s1, 4  ;;  %s49_s17 = int_to_ptr.vmem [resolvable:$true] %s48_s17 }
   0xc   :  { %54 = dma.hbm_to_vmem [thread:$0]  %s47_s16, 1024, %s49_s17, [#allocation6], %s547_s11, %s547_s11, %s548_s12  }
   0xd   :  { %542 = dma.done.wait [#allocation4], 128  }
   0xe   :  { %543 = vsyncadd [#allocation4], 4294967168 }
   0xf   :  { %544 = dma.done.wait [#allocation6], 3072  }
  0x10   :  { %545 = vsyncadd [#allocation6], 4294964224  ;;  %v445_v1 = vld [vmem:[#allocation5 + $0x38] sm:$0xff]  ;;  %v444_v3 = vld [vmem:[#allocation5 + $0x30] sm:$0xff]  ;;  %vm334_vm0 = vcmask 7168  }
  0x11   :  { %v453_v2 = vld [vmem:[#allocation5 + $0x78] sm:$0xff]  ;;  %213 = vmatpush.bf16.msra.mxu0 %v445_v1  ;;  %v452_v4 = vld [vmem:[#allocation5 + $0x70] sm:$0xff]  ;;  %v443_v6 = vld [vmem:[#allocation5 + $0x28] sm:$0xff] }
  0x12   :  { %226 = vmatpush.bf16.msra.mxu1 %v453_v2  ;;  %v461_v5 = vld [vmem:[#allocation7 + $0x38] sm:$0xff]  ;;  %v451_v7 = vld [vmem:[#allocation5 + $0x68] sm:$0xff]  ;;  %v460_v8 = vld [vmem:[#allocation7 + $0x30] sm:$0xff] }
  0x13   :  { %309 = vmatpush.bf16.msra.mxu2 %v461_v5  ;;  %v442_v9 = vld [vmem:[#allocation5 + $0x20] sm:$0xff]  ;;  %v459_v11 = vld [vmem:[#allocation7 + $0x28] sm:$0xff]  ;;  %v441_v12 = vld [vmem:[#allocation5 + $0x18] sm:$0xff] }
  0x14   :  { %v450_v10 = vld [vmem:[#allocation5 + $0x60] sm:$0xff]  ;;  %v449_v13 = vld [vmem:[#allocation5 + $0x58] sm:$0xff]  ;;  %v440_v15 = vld [vmem:[#allocation5 + $0x10] sm:$0xff] }
  0x15   :  { %214 = vmatpush.bf16.msra.mxu0 %v444_v3  ;;  %v458_v14 = vld [vmem:[#allocation7 + $0x20] sm:$0xff]  ;;  %v448_v16 = vld [vmem:[#allocation5 + $0x50] sm:$0xff]  ;;  %v457_v17 = vld [vmem:[#allocation7 + $0x18] sm:$0xff] }
  0x16   :  { %227 = vmatpush.bf16.msra.mxu1 %v452_v4  ;;  %v439_v18 = vld [vmem:[#allocation5 + $0x8] sm:$0xff]  ;;  %v73_v20 = vld [vmem:[#allocation3] sm:$0xff]  ;;  %v456_v21 = vld [vmem:[#allocation7 + $0x10] sm:$0xff] }
  0x17   :  { %310 = vmatpush.bf16.msra.mxu2 %v460_v8  ;;  %v447_v19 = vld [vmem:[#allocation5 + $0x48] sm:$0xff]  ;;  %v111_v22 = vunpack.c.l.b16 %v73_v20  ;;  %v112_v23 = vunpack.c.h.b16 %v73_v20  ;;  %v438_v24 = vld [vmem:[#allocation5] sm:$0xff]  ;;  %v467_v30 = vld [vmem:[%s617_s2] ss:$0 sm:$0xff] }
  0x18   :  { %v446_v25 = vld [vmem:[#allocation5 + $0x40] sm:$0xff]  ;;  %v455_v28 = vld [vmem:[#allocation7 + $0x8] sm:$0xff]  ;;  %v323_v39 = vld [vmem:[%s620_s5] sm:$0x1] }
  0x19   :  { %215 = vmatpush.bf16.msra.mxu0 %v443_v6  ;;  %v113_v26 = vpack.c.b16 %v111_v22, %v111_v22  ;;  %v114_v27 = vpack.c.b16 %v112_v23, %v112_v23  ;;  %v454_v29 = vld [vmem:[#allocation7] sm:$0xff]  ;;  %v468_v40 = vld [vmem:[%s619_s4] ss:$0 sm:$0xff]  ;;  %v324_v41 = vunpack.c.l.bf16 %v323_v39 }
  0x1a   :  { %228 = vmatpush.bf16.msra.mxu1 %v451_v7  ;;  %v469_v48 = vld [vmem:[#allocation2] ss:$0 sm:$0xff] }
  0x1b   :  { %311 = vmatpush.bf16.msra.mxu2 %v459_v11  ;;  %v325_v44 = vperm.slane %v324_v41, 0 }
  0x1d   :  { %216 = vmatpush.bf16.msra.mxu0 %v442_v9 }
  0x1e   :  { %229 = vmatpush.bf16.msra.mxu1 %v450_v10 }
  0x1f   :  { %312 = vmatpush.bf16.msra.mxu2 %v458_v14 }
  0x21   :  { %217 = vmatpush.bf16.msra.mxu0 %v441_v12 }
  0x22   :  { %230 = vmatpush.bf16.msra.mxu1 %v449_v13 }
  0x23   :  { %313 = vmatpush.bf16.msra.mxu2 %v457_v17 }
  0x25   :  { %218 = vmatpush.bf16.msra.mxu0 %v440_v15 }
  0x26   :  { %231 = vmatpush.bf16.msra.mxu1 %v448_v16 }
  0x27   :  { %314 = vmatpush.bf16.msra.mxu2 %v456_v21 }
  0x29   :  { %219 = vmatpush.bf16.msra.mxu0 %v439_v18 }
  0x2a   :  { %232 = vmatpush.bf16.msra.mxu1 %v447_v19 }
  0x2b   :  { %315 = vmatpush.bf16.msra.mxu2 %v455_v28 }
  0x2d   :  { %220 = vmatpush.bf16.msra.mxu0 %v438_v24 }
  0x2e   :  { %233 = vmatpush.bf16.msra.mxu1 %v446_v25 }
  0x2f   :  { %316 = vmatpush.bf16.msra.mxu2 %v454_v29 }
  0x30   :  { %221 = vmatmul.bf16.vlgmr.msra.gmra.mxu0 %v113_v26 }
  0x31   :  { %234 = vmatmul.bf16.vlgmr.msra.gmra.mxu1 %v114_v27 }
  0xad   :  { %v222_v31 = vpop.f32.mrf.mxu0 }
  0xae   :  { %v235_v32 = vpop.f32.mrf.mxu1  ;;  %v223_v33 = vadd.f32 %v467_v30, %v222_v31 }
  0xb0   :  { %v236_v34 = vadd.f32 %v235_v32, %v223_v33 }
  0xb2   :  { %v239_v35 = vmax.f32 %v236_v34, 0.0 }
  0xb4   :  { %v240_v36 = vpack.c.bf16 %v239_v35, %v239_v35 }
  0xb5   :  { %v224_v37 = vpop.f32.mrf.mxu0 }
  0xb6   :  { %v237_v38 = vpop.f32.mrf.mxu1  ;;  %317 = vmatmul.bf16.vlgmr.msra.gmra.mxu2 %v240_v36 }
 0x139   :  { %v318_v42 = vpop.f32.mrf.mxu2 }
 0x13a   :  { %v319_v43 = vadd.f32 %v468_v40, %v318_v42 }
 0x13c   :  { %v322_v45 = vmax.f32 %v319_v43, 0.0 }
 0x13e   :  { %v326_v46 = vmul.f32 %v325_v44, %v322_v45 }
 0x140   :  { %327 = vadd.xlane.f32.xlu0 %v326_v46 }
 0x141   :  { %v320_v47 = vpop.f32.mrf.mxu2 }
 0x1b3   :  { %v328_v49 = vpop.xlane.xlu0 %327 }
 0x1b4   :  { %v333_v50 = vadd.f32 %v469_v48, %v328_v49 }
 0x1b6   :  { %335 = vst.msk [vmem:[%s622_s7] sm:$0xff] %vm334_vm0, %v333_v50 }
 0x1b7   :  { %340 = vsyncpa [#allocation4], 1 }
 0x1b8   :  { %341 = vsyncpa [#allocation6], 1 }

</bundles_post_ra>
